<compile_context>
chip_gen: v7x
topology: tpu7x:2x2x1
jax: 0.10.0
libtpu: 0.0.40
codegen_flags: <defaults>
</compile_context>

<pallas_src>
import jax
import jax.numpy as jnp
from jax.experimental import pallas as pl
from jax.experimental.pallas import tpu as pltpu

_LANES = 512      # lane-dense last dim (multiple of 128) -> unmasked full-vreg stores
_TM_MAX = 1024    # max rows per tile: 1024*512*4B = 2 MiB f32 block (v5e-safe)


def _round_up(x: int, m: int) -> int:
    return ((x + m - 1) // m) * m


def _linreg_kernel(params_ref, x_ref, o_ref):
    # params_ref: (2,) f32 in SMEM -> [w, b]; x_ref/o_ref: (tm, _LANES) VMEM tiles.
    w = params_ref[0]
    b = params_ref[1]
    o_ref[...] = (x_ref[...].astype(jnp.float32) * w + b).astype(o_ref.dtype)


def linear_regression_forward(x: jax.Array, w: jax.Array, b: jax.Array) -> jax.Array:
    """x: (N, 1), w: (1, 1) (nn.Linear weight), b: (1,) (nn.Linear bias) -> (N, 1)."""
    n, f = x.shape
    assert f == 1 and w.shape == (1, 1) and b.shape == (1,)
    dtype = x.dtype

    # Pack the two scalars into one SMEM scalar-prefetch array.
    params = jnp.concatenate([w.reshape(1), b.reshape(1)]).astype(jnp.float32)

    # Lane-dense view: (N, 1) -> flat -> (rows, _LANES).  Pad only the last row.
    rows = -(-n // _LANES)                 # ceil(n / _LANES)
    padded_len = rows * _LANES
    pad = padded_len - n                   # < _LANES, and 0 when N % 512 == 0

    # Row-tile size: balanced 2-way split (v7x megacore) capped at 2 MiB blocks.
    if rows <= 8:
        tm = rows                          # single whole-array block
    else:
        tm = min(_TM_MAX, _round_up(-(-rows // 2), 8))
    grid_rows = -(-rows // tm)             # partial last block is masked by Pallas

    x_flat = x.reshape(-1)
    if pad:
        x_flat = jnp.pad(x_flat, (0, pad))
    x2d = x_flat.reshape(rows, _LANES)

    grid_spec = pltpu.PrefetchScalarGridSpec(
        num_scalar_prefetch=1,
        grid=(grid_rows,),
        in_specs=[
            pl.BlockSpec((tm, _LANES), lambda i, params_ref: (i, 0)),
        ],
        out_specs=pl.BlockSpec((tm, _LANES), lambda i, params_ref: (i, 0)),
    )

    y2d = pl.pallas_call(
        _linreg_kernel,
        out_shape=jax.ShapeDtypeStruct((rows, _LANES), dtype),
        grid_spec=grid_spec,
        compiler_params=pltpu.CompilerParams(
            dimension_semantics=("parallel",),
            # Let XLA fuse the (cheap) pad/reshape producer of x into the input DMA
            # instead of materializing a second padded copy of x in HBM.
            allow_input_fusion=[False, True],   # [params, x]
        ),
    )(params, x2d)

    if pad:
        return y2d.reshape(-1)[:n].reshape(n, 1)
    return y2d.reshape(n, 1)


if __name__ == "__main__":
    key = jax.random.PRNGKey(0)
    kx, kw, kb = jax.random.split(key, 3)

    # Shapes implied by nn.Linear(1, 1): x is (N, 1), weight (1, 1), bias (1,).
    N = 8
    x = jax.random.normal(kx, (N, 1), dtype=jnp.float32)
    w = jax.random.normal(kw, (1, 1), dtype=jnp.float32)  # nn.Linear weight (out, in)
    b = jax.random.normal(kb, (1,), dtype=jnp.float32)    # nn.Linear bias (out,)

    y = jax.block_until_ready(linear_regression_forward(x, w, b))
    y_ref = x * w[0, 0] + b[0]
    assert y.shape == (N, 1)
    assert jnp.allclose(y, y_ref, atol=1e-6, rtol=1e-6)

    # Multi-tile grid + tail-pad (partial-last-block) path.
    N2 = 600_000
    x2 = jax.random.normal(kx, (N2, 1), dtype=jnp.float32)
    y2 = jax.block_until_ready(linear_regression_forward(x2, w, b))
    y2_ref = x2 * w[0, 0] + b[0]
    assert y2.shape == (N2, 1)
    assert jnp.allclose(y2, y2_ref, atol=1e-6, rtol=1e-6)

    # Aligned fast path: no pad, no slice (N multiple of 512), balanced 2-block grid.
    N3 = 512 * 1024
    x3 = jax.random.normal(kx, (N3, 1), dtype=jnp.float32)
    y3 = jax.block_until_ready(linear_regression_forward(x3, w, b))
    y3_ref = x3 * w[0, 0] + b[0]
    assert y3.shape == (N3, 1)
    assert jnp.allclose(y3, y3_ref, atol=1e-6, rtol=1e-6)

    print("KERNEL_OK")
</pallas_src>

<mosaic_0001>
module attributes {stable_mosaic.version = 11 : i64} {
  func.func @_linreg_kernel(%arg0: i32, %arg1: memref<2xf32, #tpu.memory_space<smem>>, %arg2: memref<1x512xf32, #tpu.memory_space<vmem>>, %arg3: memref<1x512xf32, #tpu.memory_space<vmem>>) attributes {dimension_semantics = [#tpu.dimension_semantics<parallel>], iteration_bounds = array<i64: 1>, scalar_prefetch = 1 : i64, scratch_operands = 0 : i64, tpu.core_type = #tpu.core_type<tc>, window_params = [{transform_indices = @transform_0, window_bounds = array<i64: 1, 512>}, {transform_indices = @transform_1, window_bounds = array<i64: 1, 512>}]} {
    %c0 = arith.constant 0 : index
    %0 = memref.load %arg1[%c0] : memref<2xf32, #tpu.memory_space<smem>>
    %c1 = arith.constant 1 : index
    %1 = memref.load %arg1[%c1] : memref<2xf32, #tpu.memory_space<smem>>
    %c0_0 = arith.constant 0 : index
    %c0_1 = arith.constant 0 : index
    %2 = vector.load %arg2[%c0_0, %c0_1] : memref<1x512xf32, #tpu.memory_space<vmem>>, vector<1x512xf32>
    %3 = vector.broadcast %0 : f32 to vector<1x512xf32>
    %4 = arith.mulf %2, %3 : vector<1x512xf32>
    %5 = vector.broadcast %1 : f32 to vector<1x512xf32>
    %6 = arith.addf %4, %5 : vector<1x512xf32>
    %c0_2 = arith.constant 0 : index
    %c0_3 = arith.constant 0 : index
    %7 = vector.load %arg3[%c0_2, %c0_3] : memref<1x512xf32, #tpu.memory_space<vmem>>, vector<1x512xf32>
    tpu.vector_store %arg3[%c0_2, %c0_3], %6 {strides = array<i32>} : memref<1x512xf32, #tpu.memory_space<vmem>>, vector<1x512xf32>,
    return
  }
  func.func @transform_0(%arg0: i32, %arg1: memref<2xf32, #tpu.memory_space<smem>>) -> (i32, i32) {
    %c0_i32 = arith.constant 0 : i32
    %c0_i32_0 = arith.constant 0 : i32
    return %arg0, %c0_i32 : i32, i32
  }
  func.func @transform_1(%arg0: i32, %arg1: memref<2xf32, #tpu.memory_space<smem>>) -> (i32, i32) {
    %c0_i32 = arith.constant 0 : i32
    %c0_i32_0 = arith.constant 0 : i32
    return %arg0, %c0_i32 : i32, i32
  }
}

</mosaic_0001>

<bundles_post_ra>
// kernel: tpu_custom_call.1
= control target key start
LH: loop header
LB: loop body
LE: loop exit
PB: predicated region body
PF: predicated region fallthrough
CT: control target
= control target key end

     0   :  { %s171_s0 = inlined_call_operand.hbm [shape: f32[2], index: 0, kind: input, shape index: {}]   ;;  %s172_s1 = inlined_call_operand.hbm [shape: f32[1,512], index: 1, kind: input, shape index: {}]   ;;  %s173_s2 = inlined_call_operand.hbm [shape: f32[1,512], index: 2, kind: output, shape index: {}]  }
   0x1   :  { %s57_s11 = scalar_lea.hbm %s171_s0, 16 }
   0x2   :  { %p58_p0 = scmp.ne.s32.totalorder %s171_s0, %s57_s11  ;;  %p61_p1 = scmp.lt.u32.totalorder %s57_s11, %s171_s0 }
   0x4   :  { %p63_p2 = pnand %p61_p1, %p58_p0 }
   0x6   :  { %66 = shalt.err (!%p63_p2)  }
   0x7   :  { %s117_s16 = smov [#allocation3]  }
   0x8   :  { %8 = dma.hbm_to_smem %s171_s0, 16, %s117_s16, [#allocation2] }
   0x9   :  { %111 = dma.done.wait [#allocation2], 16 }
   0xa   :  { %112 = vsyncadd [#allocation2], 4294967280 }
   0xb   :  { %10 = sfence }
   0xc   :  { %11 = vsyncpa [#allocation5], 0 }
   0xd   :  { %12 = vsyncpa [#allocation6], 0  ;;  %s118_s19 = smov [#allocation4]   ;;  %s67_s23 = scalar_lea.hbm %s172_s1, 64 }
   0xe   :  { %s19_s20 = sshll.u32 %s118_s19, 4  ;;  %p68_p3 = scmp.ne.s32.totalorder %s172_s1, %s67_s23  ;;  %s20_s20 = int_to_ptr.vmem [resolvable:$true] %s19_s20 }
   0xf   :  { %p71_p4 = scmp.lt.u32.totalorder %s67_s23, %s172_s1 }
  0x11   :  { %p73_p5 = pnand %p71_p4, %p68_p3 }
  0x13   :  { %76 = shalt.err (!%p73_p5)
}
  0x14   :  { %s77_s0 = scalar_lea.vmem %s20_s20, 64  ;;  %p82_p7 = scmp.lt.s32.totalorder %s20_s20, %s20_s20 }
  0x15   :  { %p78_p6 = scmp.ne.s32.totalorder %s20_s20, %s77_s0  ;;  %p83_p8 = scmp.lt.s32.totalorder %s77_s0, %s77_s0 }
  0x17   :  { %p84_p9 = por %p83_p8, %p82_p7 }
  0x19   :  { %p85_p10 = pnand %p84_p9, %p78_p6 }
  0x1b   :  { %88 = shalt.err (!%p85_p10)
}
  0x1c   :  { %22 = dma.hbm_to_vmem [thread:$0]  %s172_s1, 64, %s20_s20, [#allocation5]  }
  0x1d   :  { %113 = dma.done.wait [#allocation5], 64  }
  0x1e   :  { %114 = vsyncadd [#allocation5], 4294967232  ;;  %s26_s30 = sld [smem:[#allocation3]]  ;;  %s53_s3 = sld [smem:[#allocation3 + $0x1]]  ;;  %v33_v0 = vlaneseq  ;;  %v28_v1 = vld [vmem:[#allocation4] sm:$0xf] }
  0x1f   :  { %s119_s4 = smov [#allocation7]  }
  0x20   :  { %s44_s5 = sshll.u32 %s119_s4, 4  ;;  %vm35_vm0 = vcmp.lt.s32.totalorder %v33_v0, 512  ;;  %s45_s5 = int_to_ptr.vmem [resolvable:$true] %s44_s5 }
  0x21   :  { %s89_s6 = scalar_lea.vmem %s45_s5, 64  ;;  %p94_p12 = scmp.lt.s32.totalorder %s45_s5, %s45_s5 }
  0x22   :  { %p90_p11 = scmp.ne.s32.totalorder %s45_s5, %s89_s6  ;;  %p95_p13 = scmp.lt.s32.totalorder %s89_s6, %s89_s6 }
  0x24   :  { %v29_v2 = vstv %s26_s30  ;;  %v31_v3 = vstv %s53_s3  ;;  %p96_p0 = por %p95_p13, %p94_p12 }
  0x25   :  { %v30_v4 = vmul.f32 %v29_v2, %v28_v1 }
  0x26   :  { %p97_p1 = pnand %p96_p0, %p90_p11 }
  0x27   :  { %v32_v5 = vadd.f32 %v31_v3, %v30_v4 }
  0x29   :  { %37 = vst.msk [vmem:[#allocation7] sm:$0xf] %vm35_vm0, %v32_v5 }
  0x2a   :  { %100 = shalt.err (!%p97_p1)
}
  0x2b   :  { %s101_s8 = scalar_lea.hbm %s173_s2, 64 }
  0x2c   :  { %p102_p2 = scmp.ne.s32.totalorder %s173_s2, %s101_s8  ;;  %p105_p3 = scmp.lt.u32.totalorder %s101_s8, %s173_s2 }
  0x2e   :  { %p107_p4 = pnand %p105_p3, %p102_p2 }
  0x30   :  { %110 = shalt.err (!%p107_p4)
}
  0x31   :  { %47 = dma.vmem_to_hbm [thread:$0]  %s45_s5, 64, %s173_s2, [#allocation6]  }
  0x32   :  { %115 = dma.done.wait [#allocation6], 64  }
  0x33   :  { %116 = vsyncadd [#allocation6], 4294967232 }
  0x34   :  { %51 = vsyncpa [#allocation5], 1 }
  0x35   :  { %52 = vsyncpa [#allocation6], 1 }

</bundles_post_ra>
